<compile_context>
chip_gen: v7x
topology: tpu7x:2x2x1
jax: 0.10.0
libtpu: 0.0.40
codegen_flags: <defaults>
</compile_context>

<pallas_src>
import functools

import jax
import jax.numpy as jnp
from jax.experimental import pallas as pl
from jax.experimental.pallas import tpu as pltpu

HIDDEN = 10     # hidden_size
IN_CH = 1       # input_size
KSIZE = 3       # kernel_size
OUT_CH = 1      # output_size
STRIDE = 2
TAU = 20

L1 = (TAU - KSIZE) // STRIDE + 1          # 9  (conv1 output length)
LP = L1 // KSIZE                          # 3  (avg_pool1d output length)
L2 = LP - KSIZE + 1                       # 1  (conv2 output length)
FDIM = L1 * HIDDEN                        # 90 (folded hidden feature width)

LANE = 128                                # TPU lane width


def _round_up(a, b):
    return ((a + b - 1) // b) * b


def _cdiv(a, b):
    return (a + b - 1) // b


def cnn_kernel(x_ref, w1t_ref, b1_ref, wfold_ref, b2_ref, out_ref):
    """One batch tile of the whole forward pass (batch on the lane axis).

    x_ref:     (TAU, TILE_N)  bf16   lane-dense input tile
    w1t_ref:   (FDIM, TAU)    bf16   folded conv1 weight (transposed)
    b1_ref:    (FDIM, 1)      f32    tiled conv1 bias
    wfold_ref: (FDIM, 1)      f32    folded avg_pool + conv2 weight
    b2_ref:    (1, 1)         f32    conv2 bias
    out_ref:   (1, TILE_N)    f32    lane-dense output slab
    """
    # conv1 (all 9 output positions at once): one bf16 MXU dot, f32 accumulate.
    hidden = jnp.dot(w1t_ref[...], x_ref[...],
                     preferred_element_type=jnp.float32)        # (FDIM, TILE_N)
    hidden = jnp.maximum(hidden + b1_ref[...], 0.0)             # bias + ReLU (VPU)

    # avg_pool(k=3) + conv2 folded into one (FDIM,) vector. Output width is 1,
    # so keep it OFF the MXU: VPU broadcast-multiply + XLU sublane reduce.
    out = jnp.sum(hidden * wfold_ref[...], axis=0, keepdims=True)   # (1, TILE_N)
    out_ref[...] = (out + b2_ref[...]).astype(out_ref.dtype)


@functools.partial(jax.jit, static_argnames=("max_tile_n",))
def cnn_forward(x, w1_conv, b1, w2_conv, b2, max_tile_n=2048):
    """x: (N, TAU) f32; conv weights in PyTorch layout.

    w1_conv: (HIDDEN, IN_CH, KSIZE), b1: (HIDDEN,)
    w2_conv: (OUT_CH, HIDDEN, KSIZE), b2: (OUT_CH,)
    Returns: (N,) f32  == PyTorch output[:, 0, 0]
    """
    N = x.shape[0]

    # ---- host-side weight folding ---------------------------------------
    # W_big[STRIDE*t + k, t*HIDDEN + h] = w1_conv[h, 0, k]; kernel uses W_big.T
    w1_kh = jnp.transpose(w1_conv[:, 0, :], (1, 0))              # (KSIZE, HIDDEN)
    W_big = jnp.zeros((TAU, FDIM), jnp.float32)
    for t in range(L1):
        W_big = W_big.at[STRIDE * t:STRIDE * t + KSIZE,
                         t * HIDDEN:(t + 1) * HIDDEN].set(w1_kh)
    W_bigT = jnp.transpose(W_big, (1, 0)).astype(jnp.bfloat16)   # (FDIM, TAU)
    b_big = jnp.tile(b1, L1).reshape(FDIM, 1).astype(jnp.float32)

    # w_fold[t*HIDDEN + h] = w2_conv[0, h, t // KSIZE] / KSIZE
    w_fold = (jnp.repeat(jnp.transpose(w2_conv[0], (1, 0)), KSIZE, axis=0)
              / float(KSIZE)).reshape(FDIM, 1).astype(jnp.float32)
    b2_2d = b2.reshape(1, 1).astype(jnp.float32)

    # ---- batch tiling (batch on lanes: tile_n must be a multiple of 128) --
    n_pad_lane = _round_up(max(N, LANE), LANE)
    n_tiles = _cdiv(n_pad_lane, max_tile_n)
    if n_pad_lane >= 2 * LANE:
        # >=2 grid steps: both v7x TensorCores get work and DMA pipelines.
        n_tiles = max(n_tiles, 2)
    # Balance tile size so N just over a tile boundary doesn't ~double work.
    tile_n = _round_up(_cdiv(n_pad_lane, n_tiles), LANE)
    n_pad = tile_n * n_tiles

    # Lane-dense, bf16-streamed input: (TAU, n_pad); padded cols are zeros.
    x_t = jnp.transpose(jnp.pad(x, ((0, n_pad - N), (0, 0))),
                        (1, 0)).astype(jnp.bfloat16)

    out = pl.pallas_call(
        cnn_kernel,
        out_shape=jax.ShapeDtypeStruct((1, n_pad), jnp.float32),
        grid=(n_tiles,),
        in_specs=[
            pl.BlockSpec((TAU, tile_n), lambda i: (0, i)),     # streamed x tile
            pl.BlockSpec((FDIM, TAU), lambda i: (0, 0)),       # VMEM-resident
            pl.BlockSpec((FDIM, 1), lambda i: (0, 0)),         # VMEM-resident
            pl.BlockSpec((FDIM, 1), lambda i: (0, 0)),         # VMEM-resident
            pl.BlockSpec((1, 1), lambda i: (0, 0)),            # VMEM-resident
        ],
        out_specs=pl.BlockSpec((1, tile_n), lambda i: (0, i)),
        compiler_params=pltpu.CompilerParams(
            dimension_semantics=("parallel",)),
        cost_estimate=pl.CostEstimate(
            flops=2 * n_pad * TAU * FDIM + 2 * n_pad * FDIM,
            transcendentals=0,
            bytes_accessed=(n_pad * TAU * 2          # x (bf16)
                            + n_pad * 4              # out (f32)
                            + FDIM * TAU * 2         # W_bigT (bf16)
                            + 2 * FDIM * 4 + 4)),    # biases / w_fold
    )(x_t, W_bigT, b_big, w_fold, b2_2d)

    return out[0, :N]


def cnn_reference(x, w1_conv, b1, w2_conv, b2):
    """Pure-JAX f32 reference replicating the PyTorch forward exactly."""
    N = x.shape[0]
    w1 = jnp.transpose(w1_conv[:, 0, :], (1, 0))                 # (3, 10)
    hs = [jnp.maximum(x[:, STRIDE * t:STRIDE * t + KSIZE] @ w1 + b1, 0.0)
          for t in range(L1)]
    hidden = jnp.stack(hs, axis=1)                               # (N, 9, 10)
    pooled = hidden.reshape(N, LP, KSIZE, HIDDEN).mean(axis=2)   # (N, 3, 10)
    out = jnp.einsum('npc,cp->n', pooled, w2_conv[0]) + b2[0]
    return out


if __name__ == "__main__":
    key = jax.random.PRNGKey(0)
    k_x, k_w1, k_b1, k_w2, k_b2 = jax.random.split(key, 5)

    # Small but non-trivial batch: exercises a 2-step grid plus tail padding.
    N = 300
    x = jax.random.normal(k_x, (N, TAU), dtype=jnp.float32)

    # Deterministic synthetic parameters (PyTorch Conv1d weight shapes).
    w1_conv = jax.random.normal(k_w1, (HIDDEN, IN_CH, KSIZE), dtype=jnp.float32) * 0.3
    b1 = jax.random.normal(k_b1, (HIDDEN,), dtype=jnp.float32) * 0.1
    w2_conv = jax.random.normal(k_w2, (OUT_CH, HIDDEN, KSIZE), dtype=jnp.float32) * 0.3
    b2 = jax.random.normal(k_b2, (OUT_CH,), dtype=jnp.float32) * 0.1

    out = jax.block_until_ready(cnn_forward(x, w1_conv, b1, w2_conv, b2))
    ref = jax.block_until_ready(cnn_reference(x, w1_conv, b1, w2_conv, b2))

    assert out.shape == (N,), out.shape
    # Tolerance loosened vs the f32 reference because x / conv1 weights are
    # streamed in bf16 (per perf review); errors are O(1e-2) absolute.
    assert jnp.allclose(out, ref, atol=5e-2, rtol=5e-2), (out, ref)
    print("KERNEL_OK")
</pallas_src>

<mosaic_0001>
module attributes {stable_mosaic.version = 11 : i64} {
  func.func @cnn_kernel(%arg0: i32, %arg1: memref<20x256xbf16, #tpu.memory_space<vmem>>, %arg2: memref<90x20xbf16, #tpu.memory_space<vmem>>, %arg3: memref<90x1xf32, #tpu.memory_space<vmem>>, %arg4: memref<90x1xf32, #tpu.memory_space<vmem>>, %arg5: memref<1x1xf32, #tpu.memory_space<vmem>>, %arg6: memref<1x256xf32, #tpu.memory_space<vmem>>) attributes {dimension_semantics = [#tpu.dimension_semantics<parallel>], iteration_bounds = array<i64: 2>, scalar_prefetch = 0 : i64, scratch_operands = 0 : i64, tpu.core_type = #tpu.core_type<tc>, window_params = [{transform_indices = @transform_0, window_bounds = array<i64: 20, 256>}, {pipeline_mode = #tpu.pipeline_mode<synchronous>, transform_indices = @transform_1, window_bounds = array<i64: 90, 20>}, {pipeline_mode = #tpu.pipeline_mode<synchronous>, transform_indices = @transform_2, window_bounds = array<i64: 90, 1>}, {pipeline_mode = #tpu.pipeline_mode<synchronous>, transform_indices = @transform_3, window_bounds = array<i64: 90, 1>}, {pipeline_mode = #tpu.pipeline_mode<synchronous>, transform_indices = @transform_4, window_bounds = array<i64: 1, 1>}, {transform_indices = @transform_5, window_bounds = array<i64: 1, 256>}]} {
    %c0 = arith.constant 0 : index
    %c0_0 = arith.constant 0 : index
    %0 = vector.load %arg2[%c0, %c0_0] : memref<90x20xbf16, #tpu.memory_space<vmem>>, vector<90x20xbf16>
    %c0_1 = arith.constant 0 : index
    %c0_2 = arith.constant 0 : index
    %1 = vector.load %arg1[%c0_1, %c0_2] : memref<20x256xbf16, #tpu.memory_space<vmem>>, vector<20x256xbf16>
    %cst = arith.constant dense<0.000000e+00> : vector<90x256xf32>
    %2 = tpu.matmul %0, %1, %cst {dimension_numbers = #tpu.dot_dimension_numbers<[1], [0], [0], [1], [0, 0, 1, 1], [], []>} : vector<90x20xbf16>, vector<20x256xbf16>, vector<90x256xf32> -> vector<90x256xf32>
    %c0_3 = arith.constant 0 : index
    %c0_4 = arith.constant 0 : index
    %3 = vector.load %arg3[%c0_3, %c0_4] : memref<90x1xf32, #tpu.memory_space<vmem>>, vector<90x1xf32>
    %4 = vector.broadcast %3 : vector<90x1xf32> to vector<90x256xf32>
    %5 = arith.addf %2, %4 : vector<90x256xf32>
    %cst_5 = arith.constant 0.000000e+00 : f32
    %6 = vector.broadcast %cst_5 : f32 to vector<90x256xf32>
    %7 = arith.maximumf %5, %6 : vector<90x256xf32>
    %c0_6 = arith.constant 0 : index
    %c0_7 = arith.constant 0 : index
    %8 = vector.load %arg4[%c0_6, %c0_7] : memref<90x1xf32, #tpu.memory_space<vmem>>, vector<90x1xf32>
    %9 = vector.broadcast %8 : vector<90x1xf32> to vector<90x256xf32>
    %10 = arith.mulf %7, %9 : vector<90x256xf32>
    %cst_8 = arith.constant dense<0.000000e+00> : vector<256xf32>
    %11 = vector.multi_reduction <add>, %10, %cst_8 [0] : vector<90x256xf32> to vector<256xf32>
    %12 = vector.shape_cast %11 : vector<256xf32> to vector<1x256xf32>
    %c0_9 = arith.constant 0 : index
    %c0_10 = arith.constant 0 : index
    %13 = vector.load %arg5[%c0_9, %c0_10] : memref<1x1xf32, #tpu.memory_space<vmem>>, vector<1x1xf32>
    %14 = vector.broadcast %13 : vector<1x1xf32> to vector<1x256xf32>
    %15 = arith.addf %12, %14 : vector<1x256xf32>
    %c0_11 = arith.constant 0 : index
    %c0_12 = arith.constant 0 : index
    %16 = vector.load %arg6[%c0_11, %c0_12] : memref<1x256xf32, #tpu.memory_space<vmem>>, vector<1x256xf32>
    tpu.vector_store %arg6[%c0_11, %c0_12], %15 {strides = array<i32>} : memref<1x256xf32, #tpu.memory_space<vmem>>, vector<1x256xf32>,
    return
  }
  func.func @transform_0(%arg0: i32) -> (i32, i32) {
    %c0_i32 = arith.constant 0 : i32
    %c0_i32_0 = arith.constant 0 : i32
    return %c0_i32, %arg0 : i32, i32
  }
  func.func @transform_1(%arg0: i32) -> (i32, i32) {
    %c0_i32 = arith.constant 0 : i32
    %c0_i32_0 = arith.constant 0 : i32
    %c0_i32_1 = arith.constant 0 : i32
    return %c0_i32, %c0_i32_0 : i32, i32
  }
  func.func @transform_2(%arg0: i32) -> (i32, i32) {
    %c0_i32 = arith.constant 0 : i32
    %c0_i32_0 = arith.constant 0 : i32
    %c0_i32_1 = arith.constant 0 : i32
    return %c0_i32, %c0_i32_0 : i32, i32
  }
  func.func @transform_3(%arg0: i32) -> (i32, i32) {
    %c0_i32 = arith.constant 0 : i32
    %c0_i32_0 = arith.constant 0 : i32
    %c0_i32_1 = arith.constant 0 : i32
    return %c0_i32, %c0_i32_0 : i32, i32
  }
  func.func @transform_4(%arg0: i32) -> (i32, i32) {
    %c0_i32 = arith.constant 0 : i32
    %c0_i32_0 = arith.constant 0 : i32
    %c0_i32_1 = arith.constant 0 : i32
    return %c0_i32, %c0_i32_0 : i32, i32
  }
  func.func @transform_5(%arg0: i32) -> (i32, i32) {
    %c0_i32 = arith.constant 0 : i32
    %c0_i32_0 = arith.constant 0 : i32
    return %c0_i32, %arg0 : i32, i32
  }
}

</mosaic_0001>

<bundles_post_ra>
// kernel: tile.8
= control target key start
LH: loop header
LB: loop body
LE: loop exit
PB: predicated region body
PF: predicated region fallthrough
CT: control target
= control target key end

     0   :  { %s28_s0 = inlined_call_operand.vmem [shape: f32[10], index: 0, kind: input, shape index: {}]   ;;  %s29_s1 = inlined_call_operand.vmem [shape: f32[9,10], index: 1, kind: output, shape index: {}]  }
   0x1   :  { %v4_v0 = vld [vmem:[%s28_s0] ss:$0 sm:$0xff] }
   0x2   :  { %5 = vst [vmem:[%s29_s1] sm:$0xff] %v4_v0  ;;  %8 = vst [vmem:[%s29_s1 + $0x8] sm:$0xff] %v4_v0 }

// kernel: tile.0
= control target key start
LH: loop header
LB: loop body
LE: loop exit
PB: predicated region body
PF: predicated region fallthrough
CT: control target
= control target key end

     0   :  { %s222_s10 = smov 126   ;;  %s223_s11 = smov 127   ;;  %vm3_vm0 = vcmask 7168   ;;  %s439_s0 = inlined_call_operand.vmem [shape: f32[9,10], index: 0, kind: input, shape index: {}]   ;;  %s440_s1 = inlined_call_operand.vmem [shape: f32[90,1], index: 1, kind: output, shape index: {}]  }
   0x1   :  { %v29_v0 = vld.sshfl [vmem:[%s439_s0] sm:$0xff pattern:$0x25814703]   ;;  %v176_v2 = vld [vmem:[%s439_s0 + $0x6] sm:$0x1]   ;;  %s224_s18 = smov 125  }
   0x2   :  { %v10_v1 = vld.sshfl [vmem:[%s439_s0] sm:$0xff pattern:$0x62581470]   ;;  %30 = vrot.lane.b32.xlu1 %v29_v0, %s222_s10  ;;  %v171_v3 = vld [vmem:[%s439_s0 + $0x3] sm:$0x1]   ;;  %s225_s23 = smov 124  }
   0x3   :  { %11 = vrot.lane.b32.xlu0 %v10_v1, %s223_s11  ;;  %v181_v4 = vld [vmem:[%s439_s0 + $0x6] sm:$0x1]   ;;  %v186_v5 = vld [vmem:[%s439_s0 + $0x2] sm:$0x1]   ;;  %s226_s26 = smov 123   ;;  %s227_s8 = smov 122  }
   0x4   :  { %v63_v6 = vld.sshfl [vmem:[%s439_s0] sm:$0xff pattern:$0x58147036]   ;;  %v191_v7 = vld [vmem:[%s439_s0 + $0x2] sm:$0x1]   ;;  %s229_s14 = smov 120  }
   0x5   :  { %v196_v8 = vld [vmem:[%s439_s0 + $0x2] sm:$0x1]   ;;  %v165_v10 = vld [vmem:[%s439_s0 + $0x8] sm:$0x1]  }
   0x6   :  { %41 = vrot.lane.b32.xlu1 %v176_v2, %s222_s10  ;;  %v2_v9 = vld [vmem:[%s439_s0] sm:$0xff]   ;;  %166 = vst.msk [vmem:[%s440_s1 + $0x50] sm:$0x1] %vm3_vm0, %v165_v10  }
   0x7   :  { %24 = vrot.lane.b32.xlu0 %v171_v3, %s223_s11  ;;  %4 = vst.msk [vmem:[%s440_s1] ss:$10 sm:$0xff] %vm3_vm0, %v2_v9   ;;  %v201_v11 = vld [vmem:[%s439_s0 + $0x2] sm:$0x1]   ;;  %s228_s11 = smov 121  }
   0x8   :  { %v206_v12 = vld [vmem:[%s439_s0 + $0x2] sm:$0x1]  }
   0x9   :  { %v211_v13 = vld [vmem:[%s439_s0 + $0x2] sm:$0x1]   ;;  %s230_s0 = smov 119  }
   0xa   :  { %58 = vrot.lane.b32.xlu1 %v181_v4, %s224_s18 }
   0xb   :  { %47 = vrot.lane.b32.xlu0 %v29_v0, %s224_s18 }
   0xe   :  { %75 = vrot.lane.b32.xlu1 %v186_v5, %s225_s23 }
   0xf   :  { %64 = vrot.lane.b32.xlu0 %v63_v6, %s225_s23 }
  0x12   :  { %92 = vrot.lane.b32.xlu1 %v191_v7, %s226_s26 }
  0x13   :  { %81 = vrot.lane.b32.xlu0 %v63_v6, %s226_s26 }
  0x16   :  { %109 = vrot.lane.b32.xlu1 %v196_v8, %s227_s8 }
  0x17   :  { %98 = vrot.lane.b32.xlu0 %v63_v6, %s227_s8 }
  0x1a   :  { %126 = vrot.lane.b32.xlu1 %v201_v11, %s228_s11 }
  0x1b   :  { %115 = vrot.lane.b32.xlu0 %v63_v6, %s228_s11 }
  0x1e   :  { %143 = vrot.lane.b32.xlu1 %v206_v12, %s229_s14 }
  0x1f   :  { %132 = vrot.lane.b32.xlu0 %v63_v6, %s229_s14 }
  0x22   :  { %160 = vrot.lane.b32.xlu1 %v211_v13, %s230_s0 }
  0x23   :  { %149 = vrot.lane.b32.xlu0 %v63_v6, %s230_s0 }
  0x74   :  { %v31_v14 = vpop.permute.xlu1 %30  }
  0x75   :  { %v12_v15 = vpop.permute.xlu0 %11   ;;  %173 = vst.msk [vmem:[%s440_s1 + $0x20] ss:$-30 sm:$0x3] %vm3_vm0, %v31_v14   ;;  %174 = vst.msk [vmem:[%s440_s1 + $0x84] ss:$-30 sm:$0x1c] %vm3_vm0, %v31_v14  }
  0x76   :  { %175 = vst.msk [vmem:[%s440_s1 + $0xe8] ss:$-30 sm:$0xe0] %vm3_vm0, %v31_v14   ;;  %167 = vst.msk [vmem:[%s440_s1 + $0x1] ss:$70 sm:$0x3] %vm3_vm0, %v12_v15  }
  0x77   :  { %168 = vst.msk [vmem:[%s440_s1 + $0x65] ss:$-30 sm:$0xc] %vm3_vm0, %v12_v15   ;;  %169 = vst.msk [vmem:[%s440_s1 + $0xc9] ss:$-30 sm:$0x70] %vm3_vm0, %v12_v15  }
  0x78   :  { %170 = vst.msk [vmem:[%s440_s1 + $0x36] sm:$0x80] %vm3_vm0, %v12_v15   ;;  %v42_v16 = vpop.permute.xlu1 %41  }
  0x79   :  { %v25_v17 = vpop.permute.xlu0 %24   ;;  %177 = vst.msk [vmem:[%s440_s1 + $0x3e] sm:$0x1] %vm3_vm0, %v42_v16  }
  0x7a   :  { %172 = vst.msk [vmem:[%s440_s1 + $0x1f] sm:$0x1] %vm3_vm0, %v25_v17  }
  0x7c   :  { %v59_v18 = vpop.permute.xlu1 %58  }
  0x7d   :  { %v48_v19 = vpop.permute.xlu0 %47   ;;  %182 = vst.msk [vmem:[%s440_s1 + $0x3f] sm:$0x1] %vm3_vm0, %v59_v18  }
  0x7e   :  { %178 = vst.msk [vmem:[%s440_s1 + $0x21] ss:$-30 sm:$0x3] %vm3_vm0, %v48_v19   ;;  %179 = vst.msk [vmem:[%s440_s1 + $0x85] ss:$-30 sm:$0x1c] %vm3_vm0, %v48_v19  }
  0x7f   :  { %180 = vst.msk [vmem:[%s440_s1 + $0xe9] ss:$-30 sm:$0xe0] %vm3_vm0, %v48_v19  }
  0x80   :  { %v76_v20 = vpop.permute.xlu1 %75  }
  0x81   :  { %v65_v21 = vpop.permute.xlu0 %64   ;;  %187 = vst.msk [vmem:[%s440_s1 + $0x18] sm:$0x1] %vm3_vm0, %v76_v20  }
  0x82   :  { %183 = vst.msk [vmem:[%s440_s1 + $0x40] ss:$-30 sm:$0x7] %vm3_vm0, %v65_v21   ;;  %184 = vst.msk [vmem:[%s440_s1 + $0xa4] ss:$-30 sm:$0x38] %vm3_vm0, %v65_v21  }
  0x83   :  { %185 = vst.msk [vmem:[%s440_s1 + $0x108] ss:$-30 sm:$0xc0] %vm3_vm0, %v65_v21  }
  0x84   :  { %v93_v22 = vpop.permute.xlu1 %92  }
  0x85   :  { %v82_v23 = vpop.permute.xlu0 %81   ;;  %192 = vst.msk [vmem:[%s440_s1 + $0x19] sm:$0x1] %vm3_vm0, %v93_v22  }
  0x86   :  { %188 = vst.msk [vmem:[%s440_s1 + $0x41] ss:$-30 sm:$0x7] %vm3_vm0, %v82_v23   ;;  %189 = vst.msk [vmem:[%s440_s1 + $0xa5] ss:$-30 sm:$0x38] %vm3_vm0, %v82_v23  }
  0x87   :  { %190 = vst.msk [vmem:[%s440_s1 + $0x109] ss:$-30 sm:$0xc0] %vm3_vm0, %v82_v23  }
  0x88   :  { %v110_v24 = vpop.permute.xlu1 %109  }
  0x89   :  { %v99_v25 = vpop.permute.xlu0 %98   ;;  %197 = vst.msk [vmem:[%s440_s1 + $0x1a] sm:$0x1] %vm3_vm0, %v110_v24  }
  0x8a   :  { %193 = vst.msk [vmem:[%s440_s1 + $0x42] ss:$-30 sm:$0x7] %vm3_vm0, %v99_v25   ;;  %194 = vst.msk [vmem:[%s440_s1 + $0xa6] ss:$-30 sm:$0x38] %vm3_vm0, %v99_v25  }
  0x8b   :  { %195 = vst.msk [vmem:[%s440_s1 + $0x10a] ss:$-30 sm:$0xc0] %vm3_vm0, %v99_v25  }
  0x8c   :  { %v127_v26 = vpop.permute.xlu1 %126  }
  0x8d   :  { %v116_v27 = vpop.permute.xlu0 %115   ;;  %202 = vst.msk [vmem:[%s440_s1 + $0x1b] sm:$0x1] %vm3_vm0, %v127_v26  }
  0x8e   :  { %198 = vst.msk [vmem:[%s440_s1 + $0x43] ss:$-30 sm:$0x7] %vm3_vm0, %v116_v27   ;;  %199 = vst.msk [vmem:[%s440_s1 + $0xa7] ss:$-30 sm:$0x38] %vm3_vm0, %v116_v27  }
  0x8f   :  { %200 = vst.msk [vmem:[%s440_s1 + $0x10b] ss:$-30 sm:$0xc0] %vm3_vm0, %v116_v27  }
  0x90   :  { %v144_v28 = vpop.permute.xlu1 %143  }
  0x91   :  { %v133_v29 = vpop.permute.xlu0 %132   ;;  %207 = vst.msk [vmem:[%s440_s1 + $0x1c] sm:$0x1] %vm3_vm0, %v144_v28  }
  0x92   :  { %203 = vst.msk [vmem:[%s440_s1 + $0x44] ss:$-30 sm:$0x7] %vm3_vm0, %v133_v29   ;;  %204 = vst.msk [vmem:[%s440_s1 + $0xa8] ss:$-30 sm:$0x38] %vm3_vm0, %v133_v29  }
  0x93   :  { %205 = vst.msk [vmem:[%s440_s1 + $0x10c] ss:$-30 sm:$0xc0] %vm3_vm0, %v133_v29  }
  0x94   :  { %v161_v30 = vpop.permute.xlu1 %160  }
  0x95   :  { %v150_v31 = vpop.permute.xlu0 %149   ;;  %212 = vst.msk [vmem:[%s440_s1 + $0x1d] sm:$0x1] %vm3_vm0, %v161_v30  }
  0x96   :  { %208 = vst.msk [vmem:[%s440_s1 + $0x45] ss:$-30 sm:$0x7] %vm3_vm0, %v150_v31   ;;  %209 = vst.msk [vmem:[%s440_s1 + $0xa9] ss:$-30 sm:$0x38] %vm3_vm0, %v150_v31  }
  0x97   :  { %210 = vst.msk [vmem:[%s440_s1 + $0x10d] ss:$-30 sm:$0xc0] %vm3_vm0, %v150_v31  }

// kernel: cnn_forward.1
= control target key start
LH: loop header
LB: loop body
LE: loop exit
PB: predicated region body
PF: predicated region fallthrough
CT: control target
= control target key end

     0   :  { %s1094_s0 = inlined_call_operand.vmem [shape: bf16[20,512], index: 0, kind: input, shape index: {}]   ;;  %s1095_s1 = inlined_call_operand.vmem [shape: bf16[90,20], index: 1, kind: input, shape index: {}]   ;;  %s1096_s2 = inlined_call_operand.vmem [shape: f32[90,1], index: 2, kind: input, shape index: {}]   ;;  %s1097_s3 = inlined_call_operand.vmem [shape: f32[90,1], index: 3, kind: input, shape index: {}]   ;;  %s1098_s4 = inlined_call_operand.<no memory space> [shape: f32[1,1], index: 4, kind: input, shape index: {}]   ;;  %s1099_s5 = inlined_call_operand.vmem [shape: f32[1,512], index: 5, kind: output, shape index: {}]  }
   0x1   :  { %v10_v0 = vstv %s1098_s4 }
   0x2   :  { %11 = vst [vmem:[#allocation2] sm:$0x1] %v10_v0 }
   0x3   :  { %s901_s20 = smov 0   ;;  %s903_s21 = smov 0  }
   0x4   :  { %s905_s22 = smov 0  }
   0x5 LB: > { %s769_s4 = sadd.s32 4294967295, %s864_s22   ;;  %s918_s23 = sadd.s32 1, %s864_s22   ;;  %s864_s22 = sphi %s905_s22, %s1102_s22   ;;  %s860_s21 = sphi %s903_s21, %s1101_s21   ;;  %s856_s20 = sphi %s901_s20, %s1100_s20  }
   0x6   : > { %s21_s24 = ssub.s32 %s864_s22, %s918_s23  ;;  %s24_s25 = sadd.s32 1, %s860_s21 }
   0x7   : > { %p22_p0 = scmp.eq.s32.totalorder %s21_s24, 0  ;;  %p31_p1 = scmp.ne.s32.totalorder %s860_s21, %s856_s20 }
   0x8   : > { %p32_p2 = scmp.eq.s32.totalorder %s864_s22, 0  ;;  %p772_p4 = scmp.ge.s32.totalorder %s864_s22, 2 }
   0x9   : > { %s927_s26 = scalar_select %p22_p0, %s860_s21, %s24_s25  }
   0xa   : > { %p33_p3 = por %p32_p2, %p31_p1  ;;  %179 = sbr.rel (%p772_p4) target bundleno = 24 (0x18), region = 32 }
  0x11   : > { %182 = sbr.rel (!%p33_p3) target bundleno = 24 (0x18), region = 36  ;;  %s184_s27 = sand.u32 (%p33_p3), 1, %s860_s21  }
  0x12   : > { %s796_s28 = sshll.u32 (%p33_p3), %s864_s22, 3  ;;  %s801_s29 = smul.u32 (%p33_p3), 24, %s184_s27 }
  0x13   : > { %s189_s7 = scalar_lea.vmem (%p33_p3), %s1094_s0, %s796_s28 }
  0x14   : > { %v221_v1 = vld [vmem:[%s189_s7] sm:$0xff] (%p33_p3)  ;;  %v223_v2 = vld [vmem:[%s189_s7 + $0x10] sm:$0xff] (%p33_p3)  ;;  %s186_s8 = scalar_lea.vmem (%p33_p3), [#allocation3], %s801_s29 }
  0x15   : > { %v225_v3 = vld [vmem:[%s189_s7 + $0x20] sm:$0xff] (%p33_p3)  ;;  %222 = vst [vmem:[%s186_s8] sm:$0xff] (%p33_p3), %v221_v1  ;;  %224 = vst [vmem:[%s186_s8 + $0x8] sm:$0xff] (%p33_p3), %v223_v2 }
  0x16   : > { %226 = vst [vmem:[%s186_s8 + $0x10] sm:$0xff] (%p33_p3), %v225_v3 }
  0x18 PF: > { %p775_p5 = scmp.ge.s32.totalorder %s864_s22, 1  ;;  %p231_p6 = scmp.lt.s32.totalorder %s864_s22, 3 }
  0x1a   : > { %p232_p7 = pnand %p775_p5, %p231_p6 }
  0x1b   : > { %s238_s9 = sand.u32 (!%p232_p7), 1, %s856_s20   ;;  %v866_v4 = vmov (!%p232_p7), 0   ;;  %vm422_vm0 = vcmask (!%p232_p7), 1041408   ;;  %v286_v10 = vld [vmem:[%s1096_s2] sm:$0xff] (!%p232_p7)  ;;  %v288_v12 = vld [vmem:[%s1096_s2 + $0x10] sm:$0xff] (!%p232_p7)  ;;  %v837_v14 = vld [vmem:[%s1095_s1 + $0x18] sm:$0xff] (!%p232_p7)  }
  0x1c   : > { %235 = sbr.rel (%p232_p7) target bundleno = 313 (0x139), region = 74  ;;  %461 = vmatprep.mubr.bf16.mxu0 (!%p232_p7), %v866_v4  ;;  %491 = vmatprep.mubr.bf16.mxu1 (!%p232_p7), %v866_v4  ;;  %v836_v13 = vld [vmem:[%s1095_s1] sm:$0xff] (!%p232_p7)   ;;  %v287_v15 = vld [vmem:[%s1096_s2 + $0x8] sm:$0xff] (!%p232_p7)  ;;  %v289_v16 = vld [vmem:[%s1096_s2 + $0x18] sm:$0xff] (!%p232_p7)  ;;  %vm403_vm1 = vcmask (!%p232_p7), 162816  }
  0x1d   : > { %s802_s10 = smul.u32 (!%p232_p7), 24, %s238_s9  ;;  %829 = vset.pattern.permute.xlu0 (!%p232_p7), %v866_v4  ;;  %830 = vset.pattern.permute.xlu1 (!%p232_p7), %v866_v4  ;;  %v546_v17 = vld [vmem:[%s1097_s3] sm:$0xff] (!%p232_p7)  ;;  %v547_v18 = vld [vmem:[%s1097_s3 + $0x8] sm:$0xff] (!%p232_p7)  ;;  %v548_v22 = vld [vmem:[%s1097_s3 + $0x10] sm:$0xff] (!%p232_p7)  ;;  %s776_s9 = sshll.u32 (!%p232_p7), %s769_s4, 1 }
  0x1e   : > { %300 = vperm.xlu0 (!%p232_p7), %829, %v286_v10   ;;  %310 = vperm.xlu1 (!%p232_p7), %830, %v288_v12   ;;  %v838_v19 = vld [vmem:[%s1095_s1 + $0x8] sm:$0xff] (!%p232_p7)   ;;  %v839_v20 = vld [vmem:[%s1095_s1 + $0x20] sm:$0xff] (!%p232_p7)   ;;  %v549_v24 = vld [vmem:[%s1097_s3 + $0x18] sm:$0xff] (!%p232_p7)  ;;  %p266_p8 = scmp.lt.s32.totalorder (!%p232_p7), %s776_s9, 3 }
  0x1f   : > { %s240_s11 = scalar_lea.vmem (!%p232_p7), [#allocation3], %s802_s10  ;;  %v290_v21 = vld [vmem:[%s1096_s2 + $0x20] sm:$0xff] (!%p232_p7)  ;;  %v291_v23 = vld [vmem:[%s1096_s2 + $0x28] sm:$0xff] (!%p232_p7)  ;;  %v840_v25 = vld [vmem:[%s1095_s1 + $0x10] sm:$0xff] (!%p232_p7)  }
  0x20   : > { %v285_v5 = vld [vmem:[%s240_s11 + $0x10] sm:$0x33] (!%p232_p7)  ;;  %v831_v6 = vld [vmem:[%s240_s11 + $0x4] ss:$8 sps:$4 sm:$0xff] (!%p232_p7)   ;;  %v833_v7 = vld [vmem:[%s240_s11] ss:$8 sps:$4 sm:$0xff] (!%p232_p7)  }
  0x21   : > { %v786_v8 = vcombine.high (!%p232_p7), %v285_v5, %v285_v5  ;;  %v785_v9 = vcombine.low (!%p232_p7), %v285_v5, %v285_v5  ;;  %429 = vmatprep.subr.bf16.mxu0 (!%p232_p7), %v831_v6  ;;  %797 = vmatprep.subr.bf16.mxu1 (!%p232_p7), %v831_v6  ;;  %v841_v26 = vld [vmem:[%s1095_s1 + $0x28] sm:$0x1f] (!%p232_p7)   ;;  %v292_v27 = vld [vmem:[%s1096_s2 + $0x30] sm:$0xff] (!%p232_p7)  ;;  %v550_v28 = vld [vmem:[%s1097_s3 + $0x20] sm:$0xff] (!%p232_p7) }
  0x22   : > { %430 = vmatpush1.bf16.msra.mxu0 (!%p232_p7), %v833_v7  ;;  %799 = vmatpush1.bf16.msra.mxu1 (!%p232_p7), %v833_v7  ;;  %v293_v29 = vld [vmem:[%s1096_s2 + $0x38] sm:$0xff] (!%p232_p7)  ;;  %v551_v30 = vld [vmem:[%s1097_s3 + $0x28] sm:$0xff] (!%p232_p7)  ;;  %v294_v31 = vld [vmem:[%s1096_s2 + $0x40] sm:$0xff] (!%p232_p7) }
  0x23   : > { %787 = vmatprep.subr.msk.bf16.mxu0 %vm422_vm0, %v786_v8  ;;  %798 = vmatprep.subr.msk.bf16.mxu1 %vm422_vm0, %v786_v8  ;;  %v424_v11 = vsel %vm422_vm0, %v785_v9, 0  ;;  %v552_v32 = vld [vmem:[%s1097_s3 + $0x30] sm:$0xff]  ;;  %v295_v33 = vld [vmem:[%s1096_s2 + $0x48] sm:$0xff]  ;;  %v553_v34 = vld [vmem:[%s1097_s3 + $0x38] sm:$0xff]  ;;  %s1104_s9 = smov (!%p266_p8, %s776_s9), 3 }
  0x24   : > { %305 = vperm.xlu0 %829, %v287_v15   ;;  %315 = vperm.xlu1 %830, %v289_v16   ;;  %v296_v35 = vld [vmem:[%s1096_s2 + $0x50] sm:$0xff]  ;;  %v554_v36 = vld [vmem:[%s1097_s3 + $0x40] sm:$0xff]  ;;  %v297_v37 = vld [vmem:[%s1096_s2 + $0x58] sm:$0x3]  ;;  %s268_s22 = scalar_lea.vmem %s1099_s5, %s1104_s9 }
  0x25   : > { %v555_v38 = vld [vmem:[%s1097_s3 + $0x48] sm:$0xff]  ;;  %v556_v39 = vld [vmem:[%s1097_s3 + $0x50] sm:$0xff]  ;;  %v557_v40 = vld [vmem:[%s1097_s3 + $0x58] sm:$0x3] }
  0x26   : > { %432 = vmatpush1.bf16.msra.mxu0 %v424_v11  ;;  %800 = vmatpush1.bf16.msra.mxu1 %v424_v11  ;;  %v678_v41 = vld [vmem:[#allocation2] sm:$0x1] }
  0x28   : > { %560 = vperm.xlu0 %829, %v546_v17   ;;  %565 = vperm.xlu1 %830, %v547_v18  }
  0x29   : > { %788 = vmatmul.mubr.msk.bf16.vlgmr.msra.gmra.mrb[0].mxu0 %vm403_vm1, %v836_v13  ;;  %791 = vmatmul.mubr.msk.bf16.vlgmr.msra.gmra.mrb[0].mxu1 %vm403_vm1, %v837_v14 }
  0x2a   : > { %471 = vmatprep.mubr.bf16.mxu0 %v866_v4  ;;  %501 = vmatprep.mubr.bf16.mxu1 %v866_v4 }
  0x2c   : > { %320 = vperm.xlu0 %829, %v290_v21   ;;  %570 = vperm.xlu1 %830, %v548_v22  }
  0x30   : > { %325 = vperm.xlu0 %829, %v291_v23   ;;  %575 = vperm.xlu1 %830, %v549_v24  }
  0x31   : > { %789 = vmatmul.mubr.msk.bf16.gmra.mrb[4].mxu0 %vm403_vm1, %v838_v19  ;;  %792 = vmatmul.mubr.msk.bf16.gmra.mrb[4].mxu1 %vm403_vm1, %v839_v20 }
  0x32   : > { %481 = vmatprep.mubr.bf16.mxu0 %v866_v4  ;;  %511 = vmatprep.mubr.bf16.mxu1 %v866_v4 }
  0x34   : > { %330 = vperm.xlu0 %829, %v292_v27   ;;  %580 = vperm.xlu1 %830, %v550_v28  }
  0x38   : > { %335 = vperm.xlu0 %829, %v293_v29   ;;  %585 = vperm.xlu1 %830, %v551_v30  }
  0x39   : > { %790 = vmatmul.mubr.msk.bf16.gmra.mrb[8].mxu0 %vm403_vm1, %v840_v25  ;;  %793 = vmatmul.mubr.msk.bf16.gmra.mrb[8].mxu1 %vm403_vm1, %v841_v26 }
  0x3c   : > { %340 = vperm.xlu0 %829, %v294_v31   ;;  %590 = vperm.xlu1 %830, %v552_v32  }
  0x40   : > { %345 = vperm.xlu0 %829, %v295_v33   ;;  %595 = vperm.xlu1 %830, %v553_v34  }
  0x44   : > { %350 = vperm.xlu0 %829, %v296_v35   ;;  %600 = vperm.xlu1 %830, %v554_v36  }
  0x48   : > { %355 = vperm.xlu0 %829, %v297_v37   ;;  %605 = vperm.xlu1 %830, %v555_v38  }
  0x4c   : > { %610 = vperm.xlu0 %829, %v556_v39   ;;  %615 = vperm.xlu1 %830, %v557_v40  }
  0x50   : > { %681 = vperm.xlu0 %829, %v678_v41  }
  0x9d   : > { %v301_v42 = vpop.permute.xlu0 %300  ;;  %v311_v43 = vpop.permute.xlu1 %310 }
  0xa3   : > { %v306_v44 = vpop.permute.xlu0 %305  ;;  %v316_v45 = vpop.permute.xlu1 %315 }
  0xa7   : > { %v561_v46 = vpop.permute.xlu0 %560  ;;  %v566_v47 = vpop.permute.xlu1 %565 }
  0xab   : > { %v1037_v48 = vpop.permute.xlu0 %320  ;;  %v571_v49 = vpop.permute.xlu1 %570 }
  0xaf   : > { %v1039_v50 = vpop.permute.xlu0 %325  ;;  %v576_v51 = vpop.permute.xlu1 %575 }
  0xb3   : > { %v331_v52 = vpop.permute.xlu0 %330  ;;  %v1041_v53 = vpop.permute.xlu1 %580 }
  0xb7   : > { %v1043_v54 = vpop.permute.xlu0 %335  ;;  %v1045_v55 = vpop.permute.xlu1 %585 }
  0xbb   : > { %v1047_v56 = vpop.permute.xlu0 %340  ;;  %v1049_v57 = vpop.permute.xlu1 %590 }
  0xbf   : > { %v1051_v10 = vpop.permute.xlu0 %345  ;;  %v1053_v11 = vpop.permute.xlu1 %595 }
  0xc3   : > { %v351_v37 = vpop.permute.xlu0 %350  ;;  %v1055_v38 = vpop.permute.xlu1 %600 }
  0xfc   : > { %v463_v58 = vpop.f32.mrb[0].mxu0  ;;  %v493_v59 = vpop.f32.mrb[0].mxu1 }
  0xfd   : > { %v464_v60 = vadd.f32 %v463_v58, %v301_v42  ;;  %v465_v61 = vpop.f32.mrb[1].mxu0  ;;  %v495_v62 = vpop.f32.mrb[1].mxu1  ;;  %v494_v32 = vadd.f32 %v493_v59, %v331_v52 }
  0xfe   : > { %v466_v63 = vadd.f32 %v465_v61, %v301_v42  ;;  %v467_v0 = vpop.f32.mrb[2].mxu0  ;;  %v497_v1 = vpop.f32.mrb[2].mxu1  ;;  %v496_v41 = vadd.f32 %v495_v62, %v331_v52 }
  0xff   : > { %v522_v2 = vmax.f32 %v464_v60, 0.0  ;;  %v468_v3 = vadd.f32 %v467_v0, %v306_v44  ;;  %v469_v4 = vpop.f32.mrb[3].mxu0  ;;  %v499_v5 = vpop.f32.mrb[3].mxu1  ;;  %v498_v61 = vadd.f32 %v497_v1, %v1043_v54 }
 0x100   : > { %v523_v6 = vmax.f32 %v466_v63, 0.0  ;;  %v470_v7 = vadd.f32 %v469_v4, %v306_v44 }
 0x101   : > { %v524_v8 = vmax.f32 %v468_v3, 0.0  ;;  %v618_v12 = vmul.f32 %v561_v46, %v522_v2  ;;  %v500_v3 = vadd.f32 %v499_v5, %v1043_v54 }
 0x102   : > { %v525_v9 = vmax.f32 %v470_v7, 0.0  ;;  %v619_v14 = vmul.f32 %v561_v46, %v523_v6  ;;  %v535_v6 = vmax.f32 %v496_v41, 0.0 }
 0x103   : > { %v620_v13 = vmul.f32 %v566_v47, %v524_v8 }
 0x104   : > { %v621_v15 = vmul.f32 %v566_v47, %v525_v9  ;;  %v473_v16 = vpop.f32.mrb[4].mxu0  ;;  %v503_v17 = vpop.f32.mrb[4].mxu1  ;;  %v534_v47 = vmax.f32 %v494_v32, 0.0 }
 0x105   : > { %v642_v18 = vadd.f32 %v620_v13, %v618_v12  ;;  %v474_v19 = vadd.f32 %v473_v16, %v311_v43  ;;  %v475_v20 = vpop.f32.mrb[5].mxu0  ;;  %v505_v21 = vpop.f32.mrb[5].mxu1  ;;  %v504_v1 = vadd.f32 %v503_v17, %v1047_v56  ;;  %v536_v13 = vmax.f32 %v498_v61, 0.0 }
 0x106   : > { %v660_v22 = vadd.f32 %v621_v15, %v619_v14  ;;  %v476_v23 = vadd.f32 %v475_v20, %v311_v43  ;;  %v477_v24 = vpop.f32.mrb[6].mxu0  ;;  %v507_v25 = vpop.f32.mrb[6].mxu1  ;;  %v630_v9 = vmul.f32 %v1049_v57, %v534_v47  ;;  %v506_v14 = vadd.f32 %v505_v21, %v1047_v56 }
 0x107   : > { %v526_v26 = vmax.f32 %v474_v19, 0.0  ;;  %v478_v27 = vadd.f32 %v477_v24, %v316_v45  ;;  %v479_v28 = vpop.f32.mrb[7].mxu0  ;;  %v509_v29 = vpop.f32.mrb[7].mxu1  ;;  %v537_v16 = vmax.f32 %v500_v3, 0.0  ;;  %v684_v3 = vlaneseq }
 0x108   : > { %v527_v30 = vmax.f32 %v476_v23, 0.0  ;;  %v480_v31 = vadd.f32 %v479_v28, %v316_v45  ;;  %v356_v15 = vpop.permute.xlu0 %355  ;;  %v510_v20 = vadd.f32 %v509_v29, %v1051_v10  ;;  %v606_v24 = vpop.permute.xlu1 %605  ;;  %v539_v28 = vmax.f32 %v506_v14, 0.0 }
 0x109   : > { %v622_v33 = vmul.f32 %v571_v49, %v526_v26  ;;  %v528_v34 = vmax.f32 %v478_v27, 0.0  ;;  %v538_v26 = vmax.f32 %v504_v1, 0.0  ;;  %v867_v1 = vmov 1966171168  }
 0x10a   : > { %v623_v35 = vmul.f32 %v571_v49, %v527_v30  ;;  %v529_v36 = vmax.f32 %v480_v31, 0.0  ;;  %v541_v29 = vmax.f32 %v510_v20, 0.0  ;;  %v635_v41 = vmul.f32 %v1055_v38, %v539_v28 }
 0x10b   : > { %v643_v39 = vadd.f32 %v642_v18, %v622_v33  ;;  %v624_v40 = vmul.f32 %v576_v51, %v528_v34  ;;  %v508_v18 = vadd.f32 %v507_v25, %v1051_v10  ;;  %v632_v25 = vmul.f32 %v1053_v11, %v536_v13 }
 0x10c   : > { %v661_v42 = vadd.f32 %v660_v22, %v623_v35  ;;  %v625_v43 = vmul.f32 %v576_v51, %v529_v36  ;;  %v483_v44 = vpop.f32.mrb[8].mxu0  ;;  %v513_v46 = vpop.f32.mrb[8].mxu1  ;;  %v633_v10 = vmul.f32 %v1053_v11, %v537_v16  ;;  %v637_v47 = vmul.f32 %v606_v24, %v541_v29 }
 0x10d   : > { %v644_v58 = vadd.f32 %v643_v39, %v624_v40  ;;  %v484_v60 = vadd.f32 %v483_v44, %v1037_v48  ;;  %v485_v45 = vpop.f32.mrb[9].mxu0  ;;  %v515_v59 = vpop.f32.mrb[9].mxu1  ;;  %v514_v27 = vadd.f32 %v513_v46, %v351_v37  ;;  %v540_v32 = vmax.f32 %v508_v18, 0.0 }
 0x10e   : > { %v662_v49 = vadd.f32 %v661_v42, %v625_v43  ;;  %v486_v63 = vadd.f32 %v485_v45, %v1037_v48  ;;  %v487_v0 = vpop.f32.mrb[10].mxu0  ;;  %v517_v2 = vpop.f32.mrb[10].mxu1  ;;  %v516_v30 = vadd.f32 %v515_v59, %v351_v37  ;;  %vm710_vm2 = vcmp.lt.s32.totalorder %v684_v3, 256 }
 0x10f   : > { %v530_v52 = vmax.f32 %v484_v60, 0.0  ;;  %v488_v51 = vadd.f32 %v487_v0, %v1039_v50  ;;  %v489_v62 = vpop.f32.mrb[11].mxu0  ;;  %v519_v4 = vpop.f32.mrb[11].mxu1  ;;  %v518_v17 = vadd.f32 %v517_v2, %v356_v15  ;;  %v542_v36 = vmax.f32 %v514_v27, 0.0 }
 0x110   : > { %v531_v7 = vmax.f32 %v486_v63, 0.0  ;;  %v490_v8 = vadd.f32 %v489_v62, %v1039_v50  ;;  %v520_v21 = vadd.f32 %v519_v4, %v356_v15  ;;  %v616_v37 = vpop.permute.xlu1 %615  ;;  %v636_v43 = vmul.f32 %v606_v24, %v540_v32  ;;  %v611_v46 = vpop.permute.xlu0 %610 }
 0x111   : > { %v626_v12 = vmul.f32 %v1041_v53, %v530_v52  ;;  %v532_v48 = vmax.f32 %v488_v51, 0.0  ;;  %v544_v34 = vmax.f32 %v518_v17, 0.0  ;;  %v638_v11 = vmul.f32 %v611_v46, %v542_v36 }
 0x112   : > { %v627_v54 = vmul.f32 %v1041_v53, %v531_v7  ;;  %v533_v5 = vmax.f32 %v490_v8, 0.0  ;;  %v631_v53 = vmul.f32 %v1049_v57, %v535_v6  ;;  %v545_v40 = vmax.f32 %v520_v21, 0.0 }
 0x113   : > { %v645_v19 = vadd.f32 %v644_v58, %v626_v12  ;;  %v628_v50 = vmul.f32 %v1045_v55, %v532_v48  ;;  %v543_v57 = vmax.f32 %v516_v30, 0.0  ;;  %v640_v58 = vmul.f32 %v616_v37, %v544_v34 }
 0x114   : > { %v663_v22 = vadd.f32 %v662_v49, %v627_v54  ;;  %v629_v23 = vmul.f32 %v1045_v55, %v533_v5  ;;  %v634_v55 = vmul.f32 %v1055_v38, %v538_v26  ;;  %v641_v59 = vmul.f32 %v616_v37, %v545_v40  ;;  %v682_v54 = vpop.permute.xlu0 %681 }
 0x115   : > { %v646_v56 = vadd.f32 %v645_v19, %v628_v50  ;;  %v639_v61 = vmul.f32 %v611_v46, %v543_v57  ;;  %v652_v0 = vsel %vm422_vm0, %v640_v58, 0.0  ;;  %v685_v6 = vshrl.u32 %v684_v3, 7 }
 0x116   : > { %v664_v31 = vadd.f32 %v663_v22, %v629_v23  ;;  %v670_v52 = vsel %vm422_vm0, %v641_v59, 0.0  ;;  %v694_v12 = vunpack.c.l.s4 %v867_v1 }
 0x117   : > { %v647_v33 = vadd.f32 %v646_v56, %v630_v9  ;;  %v686_v13 = vsub.s32 0, %v685_v6 }
 0x118   : > { %v665_v35 = vadd.f32 %v664_v31, %v631_v53  ;;  %v695_v16 = vunpack.c.0.s8 %v694_v12 }
 0x119   : > { %v648_v39 = vadd.f32 %v647_v33, %v632_v25  ;;  %v687_v19 = vrot.slane %v682_v54, %v686_v13 }
 0x11a   : > { %v666_v42 = vadd.f32 %v665_v35, %v633_v10  ;;  %v698_v17 = vsub.s32 %v695_v16, %v685_v6 }
 0x11b   : > { %v649_v44 = vadd.f32 %v648_v39, %v634_v55 }
 0x11c   : > { %v667_v60 = vadd.f32 %v666_v42, %v635_v41 }
 0x11d   : > { %v650_v45 = vadd.f32 %v649_v44, %v636_v43 }
 0x11e   : > { %v668_v49 = vadd.f32 %v667_v60, %v637_v47 }
 0x11f   : > { %v651_v63 = vadd.f32 %v650_v45, %v638_v11 }
 0x120   : > { %v669_v2 = vadd.f32 %v668_v49, %v639_v61 }
 0x121   : > { %v653_v38 = vadd.f32 %v652_v0, %v651_v63 }
 0x122   : > { %v671_v51 = vadd.f32 %v670_v52, %v669_v2 }
 0x123   : > { %v654_v62 = vrot.slane %v653_v38, 4 }
 0x124   : > { %v672_v4 = vrot.slane %v671_v51, 4 }
 0x125   : > { %v655_v7 = vadd.f32 %v654_v62, %v653_v38 }
 0x126   : > { %v673_v8 = vadd.f32 %v672_v4, %v671_v51 }
 0x127   : > { %v656_v9 = vrot.slane %v655_v7, 2 }
 0x128   : > { %v674_v48 = vrot.slane %v673_v8, 2 }
 0x129   : > { %v657_v14 = vadd.f32 %v656_v9, %v655_v7 }
 0x12a   : > { %v675_v5 = vadd.f32 %v674_v48, %v673_v8 }
 0x12b   : > { %v658_v15 = vrot.slane %v657_v14, 1 }
 0x12c   : > { %v676_v18 = vrot.slane %v675_v5, 1 }
 0x12d   : > { %v659_v50 = vadd.f32 %v658_v15, %v657_v14 }
 0x12e   : > { %v677_v20 = vadd.f32 %v676_v18, %v675_v5 }
 0x12f   : > { %v688_v22 = vadd.f32 %v687_v19, %v659_v50 }
 0x130   : > { %v689_v23 = vadd.f32 %v687_v19, %v677_v20 }
 0x132   : > { %v692_v24 = vcombine.low %v688_v22, %v689_v23 }
 0x134   : > { %v699_v26 = vrot.slane %v692_v24, %v698_v17 }
 0x136   : > { %v706_v27 = vrot.slane %v699_v26, %v698_v17 }
 0x138   : > { %712 = vst.msk [vmem:[%s268_s22] sm:$0x3] %vm710_vm2, %v706_v27 }
 0x139 PF: > { %p14_p9 = scmp.ge.s32.totalorder %s918_s23, 4   ;;  %s1100_s20 = smov %s860_s21 }
 0x13a   : > { %s1101_s21 = smov %s927_s26  ;;  %s1102_s22 = smov %s918_s23 }
 0x13b   :  { %16 = sbr.rel (!%p14_p9) target bundleno = 5 (0x5), region = 113 }

</bundles_post_ra>
